<compile_context>
chip_gen: v7x
topology: tpu7x:2x2x1
jax: 0.10.0
libtpu: 0.0.40
codegen_flags: <defaults>
</compile_context>

<pallas_src>
import math

import jax
import jax.numpy as jnp
from jax.experimental import pallas as pl
from jax.experimental.pallas import tpu as pltpu


def _denorm_kernel(x_ref, scale_ref, shift_ref, o_ref):
    # y = x * sigma_c + mean_c ; scale/shift broadcast across lanes (shape (tb, 1)) or
    # across sublanes (shape (1, tc)), depending on the layout chosen by the wrapper.
    o_ref[...] = x_ref[...] * scale_ref[...] + shift_ref[...]


def _pick_tiles(n_rows: int, width: int, itemsize: int,
                tb_max: int, vmem_budget_bytes: int):
    """Pick (row_tile, lane_tile) so that ~4 live blocks (2x-buffered in + out) fit the budget."""
    # Lane tile: prefer the full width; only tile the lane axis when a single 8-row block
    # of the full width would blow the budget.  Tiled lane width is a multiple of 128.
    lane_cap = max(128, (vmem_budget_bytes // (4 * 8 * itemsize)) // 128 * 128)
    tw = width if width <= lane_cap else lane_cap

    per_row = max(1, tw) * itemsize
    rows_cap = max(1, vmem_budget_bytes // (4 * per_row))
    tb = min(tb_max, rows_cap)
    if tb >= n_rows:
        tb = n_rows                      # full dim -> always a legal block shape
    else:
        tb = max(8, (tb // 8) * 8)       # multiple of 8 -> legal sublane tiling
    return tb, tw


def denormalization_pallas(x: jax.Array, mean: jax.Array, sigma: jax.Array,
                           *, tb_rows: int = 1024,
                           vmem_budget_bytes: int = 16 << 20) -> jax.Array:
    """y = x * sigma[None, :, None, ...] + mean[None, :, None, ...] for x of shape (B, C, ...)."""
    orig_shape = x.shape
    assert x.ndim >= 2, "DeNormalization expects at least (B, C)"
    B, C = x.shape[0], x.shape[1]
    S = math.prod(x.shape[2:]) if x.ndim > 2 else 1
    dtype = x.dtype
    itemsize = jnp.dtype(dtype).itemsize

    mean = mean.reshape(C).astype(dtype)
    sigma = sigma.reshape(C).astype(dtype)

    compiler_params = pltpu.CompilerParams(
        dimension_semantics=("parallel", "parallel"))

    if x.ndim == 2:
        # (B, C): channel axis on lanes; sigma/mean are a single (1, C) row broadcast
        # over sublanes inside the kernel.
        R, W = B, C
        x2 = x
        scale = sigma.reshape(1, C)
        shift = mean.reshape(1, C)
        tb, tw = _pick_tiles(R, W, itemsize, tb_rows, vmem_budget_bytes)
        out2 = pl.pallas_call(
            _denorm_kernel,
            out_shape=jax.ShapeDtypeStruct((R, W), dtype),
            grid=(pl.cdiv(R, tb), pl.cdiv(W, tw)),
            in_specs=[pl.BlockSpec((tb, tw), lambda i, j: (i, j)),
                      pl.BlockSpec((1, tw), lambda i, j: (0, j)),
                      pl.BlockSpec((1, tw), lambda i, j: (0, j))],
            out_specs=pl.BlockSpec((tb, tw), lambda i, j: (i, j)),
            compiler_params=compiler_params,
        )(x2, scale, shift)
        return out2

    # ndim > 2: flatten to (B*C, S) rows; spatial extent S is the lane axis (lane-dense
    # loads/stores), and each row carries its channel's scale/shift as a (tb, 1) column.
    R, W = B * C, S
    x2 = x.reshape(R, W)
    scale = jnp.tile(sigma, (B,)).reshape(R, 1)
    shift = jnp.tile(mean, (B,)).reshape(R, 1)

    tb, tw = _pick_tiles(R, W, itemsize, tb_rows, vmem_budget_bytes)

    out2 = pl.pallas_call(
        _denorm_kernel,
        out_shape=jax.ShapeDtypeStruct((R, W), dtype),
        grid=(pl.cdiv(R, tb), pl.cdiv(W, tw)),
        in_specs=[pl.BlockSpec((tb, tw), lambda i, j: (i, j)),
                  pl.BlockSpec((tb, 1), lambda i, j: (i, 0)),
                  pl.BlockSpec((tb, 1), lambda i, j: (i, 0))],
        out_specs=pl.BlockSpec((tb, tw), lambda i, j: (i, j)),
        compiler_params=compiler_params,
    )(x2, scale, shift)
    return out2.reshape(orig_shape)


def denormalization_reference(x: jax.Array, mean: jax.Array, sigma: jax.Array) -> jax.Array:
    target_shape = (1, -1) + (1,) * (x.ndim - 2)
    return x * sigma.reshape(target_shape) + mean.reshape(target_shape)


if __name__ == "__main__":
    key = jax.random.PRNGKey(0)
    B, C, H, W = 2, 4, 16, 16
    k1, k2, k3 = jax.random.split(key, 3)
    x = jax.random.normal(k1, (B, C, H, W), dtype=jnp.float32)
    mean = jax.random.normal(k2, (C,), dtype=jnp.float32)
    sigma = jax.random.uniform(k3, (C,), dtype=jnp.float32, minval=0.5, maxval=2.0)

    out = denormalization_pallas(x, mean, sigma)
    out = jax.block_until_ready(out)
    ref = denormalization_reference(x, mean, sigma)
    assert out.shape == x.shape
    assert jnp.allclose(out, ref, atol=1e-5, rtol=1e-5)

    # Also exercise the 2-D (B, C) path of the module.
    x2d = jax.random.normal(k1, (B, C), dtype=jnp.float32)
    out2d = jax.block_until_ready(denormalization_pallas(x2d, mean, sigma))
    assert jnp.allclose(out2d, denormalization_reference(x2d, mean, sigma), atol=1e-5, rtol=1e-5)

    print("KERNEL_OK")
</pallas_src>

<mosaic_0001>
module attributes {stable_mosaic.version = 11 : i64} {
  func.func @_denorm_kernel(%arg0: i32, %arg1: i32, %arg2: memref<8x256xf32, #tpu.memory_space<vmem>>, %arg3: memref<8x1xf32, #tpu.memory_space<vmem>>, %arg4: memref<8x1xf32, #tpu.memory_space<vmem>>, %arg5: memref<8x256xf32, #tpu.memory_space<vmem>>) attributes {dimension_semantics = [#tpu.dimension_semantics<parallel>, #tpu.dimension_semantics<parallel>], iteration_bounds = array<i64: 1, 1>, scalar_prefetch = 0 : i64, scratch_operands = 0 : i64, tpu.core_type = #tpu.core_type<tc>, window_params = [{transform_indices = @transform_0, window_bounds = array<i64: 8, 256>}, {transform_indices = @transform_1, window_bounds = array<i64: 8, 1>}, {transform_indices = @transform_2, window_bounds = array<i64: 8, 1>}, {transform_indices = @transform_3, window_bounds = array<i64: 8, 256>}]} {
    %c0 = arith.constant 0 : index
    %c0_0 = arith.constant 0 : index
    %0 = vector.load %arg2[%c0, %c0_0] : memref<8x256xf32, #tpu.memory_space<vmem>>, vector<8x256xf32>
    %c0_1 = arith.constant 0 : index
    %c0_2 = arith.constant 0 : index
    %1 = vector.load %arg3[%c0_1, %c0_2] : memref<8x1xf32, #tpu.memory_space<vmem>>, vector<8x1xf32>
    %2 = vector.broadcast %1 : vector<8x1xf32> to vector<8x256xf32>
    %3 = arith.mulf %0, %2 : vector<8x256xf32>
    %c0_3 = arith.constant 0 : index
    %c0_4 = arith.constant 0 : index
    %4 = vector.load %arg4[%c0_3, %c0_4] : memref<8x1xf32, #tpu.memory_space<vmem>>, vector<8x1xf32>
    %5 = vector.broadcast %4 : vector<8x1xf32> to vector<8x256xf32>
    %6 = arith.addf %3, %5 : vector<8x256xf32>
    %c0_5 = arith.constant 0 : index
    %c0_6 = arith.constant 0 : index
    %7 = vector.load %arg5[%c0_5, %c0_6] : memref<8x256xf32, #tpu.memory_space<vmem>>, vector<8x256xf32>
    tpu.vector_store %arg5[%c0_5, %c0_6], %6 {strides = array<i32>} : memref<8x256xf32, #tpu.memory_space<vmem>>, vector<8x256xf32>,
    return
  }
  func.func @transform_0(%arg0: i32, %arg1: i32) -> (i32, i32) {
    %c0_i32 = arith.constant 0 : i32
    return %arg0, %arg1 : i32, i32
  }
  func.func @transform_1(%arg0: i32, %arg1: i32) -> (i32, i32) {
    %c0_i32 = arith.constant 0 : i32
    %c0_i32_0 = arith.constant 0 : i32
    return %arg0, %c0_i32 : i32, i32
  }
  func.func @transform_2(%arg0: i32, %arg1: i32) -> (i32, i32) {
    %c0_i32 = arith.constant 0 : i32
    %c0_i32_0 = arith.constant 0 : i32
    return %arg0, %c0_i32 : i32, i32
  }
  func.func @transform_3(%arg0: i32, %arg1: i32) -> (i32, i32) {
    %c0_i32 = arith.constant 0 : i32
    return %arg0, %arg1 : i32, i32
  }
}

</mosaic_0001>

<bundles_post_ra>
// kernel: tpu_custom_call.1
= control target key start
LH: loop header
LB: loop body
LE: loop exit
PB: predicated region body
PF: predicated region fallthrough
CT: control target
= control target key end

     0   :  { %s122_s0 = inlined_call_operand.vmem [shape: f32[8,256], index: 0, kind: input, shape index: {}]   ;;  %s123_s1 = inlined_call_operand.vmem [shape: f32[8,1], index: 1, kind: input, shape index: {}]   ;;  %s124_s2 = inlined_call_operand.vmem [shape: f32[8,1], index: 2, kind: input, shape index: {}]   ;;  %s125_s3 = inlined_call_operand.hbm [shape: f32[8,256], index: 3, kind: output, shape index: {}]  }
   0x1   :  { %v17_v0 = vld [vmem:[%s123_s1] sm:$0xff] }
   0x2   :  { %8 = vsyncpa [#allocation3], 0  ;;  %v76_v1 = vmov 0   ;;  %v25_v2 = vld [vmem:[%s124_s2] sm:$0xff]  ;;  %v16_v5 = vld [vmem:[%s122_s0 + $0x8] sm:$0xff]  ;;  %s77_s20 = smov [#allocation2]  }
   0x3   :  { %51 = vset.pattern.permute.xlu0 %v76_v1  ;;  %v15_v4 = vld [vmem:[%s122_s0] sm:$0xff]  ;;  %s41_s1 = sshll.u32 %s77_s20, 4  ;;  %s42_s1 = int_to_ptr.vmem [resolvable:$true] %s41_s1 }
   0x4   :  { %20 = vperm.xlu0 %51, %v17_v0   ;;  %s52_s2 = scalar_lea.vmem %s42_s1, 256  ;;  %p57_p1 = scmp.lt.s32.totalorder %s42_s1, %s42_s1 }
   0x5   :  { %p53_p0 = scmp.ne.s32.totalorder %s42_s1, %s52_s2  ;;  %p58_p2 = scmp.lt.s32.totalorder %s52_s2, %s52_s2 }
   0x7   :  { %p59_p3 = por %p58_p2, %p57_p1 }
   0x8   :  { %28 = vperm.xlu0 %51, %v25_v2  }
   0x9   :  { %p60_p4 = pnand %p59_p3, %p53_p0 }
  0x83   :  { %v21_v3 = vpop.permute.xlu0 %20 }
  0x84   :  { %v23_v6 = vmul.f32 %v21_v3, %v15_v4  ;;  %v24_v7 = vmul.f32 %v21_v3, %v16_v5 }
  0x87   :  { %v29_v8 = vpop.permute.xlu0 %28 }
  0x88   :  { %v31_v9 = vadd.f32 %v29_v8, %v23_v6  ;;  %v32_v10 = vadd.f32 %v29_v8, %v24_v7 }
  0x8a   :  { %33 = vst [vmem:[#allocation2] sm:$0xff] %v31_v9  ;;  %34 = vst [vmem:[#allocation2 + $0x8] sm:$0xff] %v32_v10 }
  0x8b   :  { %63 = shalt.err (!%p60_p4)
}
  0x8c   :  { %s64_s0 = scalar_lea.hbm %s125_s3, 256 }
  0x8d   :  { %p65_p5 = scmp.ne.s32.totalorder %s125_s3, %s64_s0  ;;  %p68_p6 = scmp.lt.u32.totalorder %s64_s0, %s125_s3 }
  0x8f   :  { %p70_p7 = pnand %p68_p6, %p65_p5 }
  0x91   :  { %73 = shalt.err (!%p70_p7)
}
  0x92   :  { %44 = dma.vmem_to_hbm [thread:$0]  %s42_s1, 256, %s125_s3, [#allocation3]  }
  0x93   :  { %74 = dma.done.wait [#allocation3], 256  }
  0x94   :  { %75 = vsyncadd [#allocation3], 4294967040 }
  0x95   :  { %48 = vsyncpa [#allocation3], 1 }

</bundles_post_ra>
